<compile_context>
chip_gen: v5e
topology: v5e:2x2
jax: 0.10.0
libtpu: 0.0.40
codegen_flags: <defaults>
</compile_context>

<pallas_src>
import functools

import jax
import jax.numpy as jnp
from jax.experimental import pallas as pl
from jax.experimental.pallas import tpu as pltpu


def _round_up(x, m):
    return ((x + m - 1) // m) * m


# --------------------------------------------------------------------------
# Fused orthogonal-projection + separable bilinear-index kernel
# --------------------------------------------------------------------------
def _pifu_query_kernel(calib_ref, hmin_ref, hmax_ref, pts_ref, feat_ref, out_ref,
                       y0_s, wy1_s, wx_s, acc_s, *, H, c_chunk):
    b = pl.program_id(0)
    n = pl.program_id(1)
    h = pl.program_id(2)
    C, H_tile, W = feat_ref.shape
    n_tile = pts_ref.shape[1]

    # ---- per-(batch, N-tile) setup, hoisted out of the H reduction loop ----
    @pl.when(h == 0)
    def _setup():
        pts = pts_ref[...]                                    # [3, n_tile] f32
        x, y, z = pts[0:1, :], pts[1:2, :], pts[2:3, :]
        # Orthogonal projection on the VPU (calib scalars live in SMEM).
        u = (calib_ref[b, 0] * x + calib_ref[b, 1] * y
             + calib_ref[b, 2] * z + calib_ref[b, 3])         # [1, n_tile]
        v = (calib_ref[b, 4] * x + calib_ref[b, 5] * y
             + calib_ref[b, 6] * z + calib_ref[b, 7])
        # align_corners=True pixel coordinates; clamp so wild calibs cannot
        # wrap around int32 and alias a valid texel (still contribute zero).
        px = jnp.clip((u + 1.0) * (0.5 * (W - 1)), -2.0, W + 1.0)
        py = jnp.clip((v + 1.0) * (0.5 * (H - 1)), -2.0, H + 1.0)
        # Separable x one-hot weights [W, n_tile] (OOB indices never match).
        x0f = jnp.floor(px)
        wx1 = px - x0f
        x0 = x0f.astype(jnp.int32)
        w_iota = jax.lax.broadcasted_iota(jnp.int32, (W, n_tile), 0)
        wx_mat = jnp.where(w_iota == x0, 1.0 - wx1,
                           jnp.where(w_iota == x0 + 1, wx1, 0.0))
        wx_s[...] = wx_mat.astype(wx_s.dtype)                 # bf16 for the MXU
        # y decomposition hoisted (one subtract + two compares per H step).
        y0f = jnp.floor(py)
        wy1_s[...] = py - y0f
        y0_s[...] = y0f.astype(jnp.int32)
        acc_s[...] = jnp.zeros_like(acc_s)

    # ---- per-H-tile contribution; skipped entirely outside [hmin, hmax] ----
    idx = b * pl.num_programs(1) + n
    lo = hmin_ref[idx]
    hi = hmax_ref[idx]

    @pl.when((h >= lo) & (h <= hi))
    def _accumulate():
        y0 = y0_s[...] - h * H_tile                           # tile-local row
        wy1 = wy1_s[...]
        h_iota = jax.lax.broadcasted_iota(jnp.int32, (H_tile, n_tile), 0)
        wy_mat = jnp.where(h_iota == y0, 1.0 - wy1,
                           jnp.where(h_iota == y0 + 1, wy1, 0.0))
        wy_b = wy_mat[None, :, :]                             # [1, H_tile, n_tile]
        wx = wx_s[...]
        # C-chunked matmul + weighted reduce: live temporaries stay at
        # ~c_chunk*h_tile*n_tile f32 instead of C*h_tile*n_tile.
        for ci in range(C // c_chunk):                        # static, unrolled
            c0 = ci * c_chunk
            f = feat_ref[c0:c0 + c_chunk, :, :].reshape(c_chunk * H_tile, W)
            g = jnp.dot(f, wx, preferred_element_type=jnp.float32)
            g3 = g.reshape(c_chunk, H_tile, n_tile)
            acc_s[c0:c0 + c_chunk, :] += jnp.sum(g3 * wy_b, axis=1)

    @pl.when(h == pl.num_programs(2) - 1)
    def _finalize():
        out_ref[...] = acc_s[...].astype(out_ref.dtype)


# --------------------------------------------------------------------------
# Wrapper: tiling, y-bucketing, scalar prefetch, pallas_call
# --------------------------------------------------------------------------
def _vmem_limit_bytes():
    try:
        cap = int(pltpu.get_tpu_info().vmem_capacity_bytes)
    except Exception:
        cap = 128 * 1024 * 1024
    # ~5/8 of physical: ~40 MiB on v7x (64 MiB VMEM), 64 MiB cap on v5e/v6e.
    return min((cap * 5) // 8, 64 * 1024 * 1024)


def _feat_block_spec(block_shape, index_map, buffers):
    if buffers is not None and buffers != 2:
        try:
            return pl.BlockSpec(block_shape, index_map,
                                pipeline_mode=pl.Buffered(buffers))
        except (TypeError, AttributeError):
            pass
    return pl.BlockSpec(block_shape, index_map)


def pifu_forward(points, images, calibs, transforms=None, *,
                 n_tile=512,            # 1024 recommended on v6e, 384-512 on v7x
                 h_tile_target=32,
                 c_chunk=32,
                 feat_buffers=2,        # set 3 on v6e (per-step DMA ~ matmul)
                 out_dtype=jnp.float32  # bf16 if the downstream MLP is bf16
                 ):
    """points [B,3,N], images [B,C,H,W] (NCHW), calibs [B,3,4] -> preds [B,C,N]."""
    del transforms  # no-op in the abstract base class
    B, C, H, W = images.shape
    N = points.shape[2]

    # ---- N tiling: pad to a multiple of n_tile; keep >=2 (b,n) grid points ----
    n_tile = min(n_tile, _round_up(N, 128))
    if B == 1 and N > 128:
        n_tile = min(n_tile, _round_up(pl.cdiv(N, 2), 128))  # feed both v7x TCs
    npad = _round_up(N, n_tile)
    nt = npad // n_tile

    # ---- H tiling: multiples of 16 (bf16 sublane packing); zero-pad H ----
    h_tile = max(16, (h_tile_target // 16) * 16)
    H_pad = _round_up(H, 16)
    if H_pad <= h_tile:
        h_tile = H_pad
    else:
        H_pad = _round_up(H, h_tile)
    ht = H_pad // h_tile

    # ---- C chunk for the in-kernel matmul ----
    c_chunk = max(1, min(c_chunk, C))
    while C % c_chunk:
        c_chunk -= 1

    pts = jnp.zeros((B, 3, npad), jnp.float32).at[:, :, :N].set(
        points.astype(jnp.float32))
    feat = images.astype(jnp.bfloat16)                 # halve HBM traffic
    if H_pad != H:
        feat = jnp.pad(feat, ((0, 0), (0, 0), (0, H_pad - H), (0, 0)))
    calib_flat = calibs.reshape(B, 12).astype(jnp.float32)   # -> SMEM scalars

    # ---- y-bucket points so each N-tile touches only a few H tiles ----
    rot_y = calibs[:, 1, :3].astype(jnp.float32)             # [B, 3]
    t_y = calibs[:, 1, 3:].astype(jnp.float32)               # [B, 1]
    v = jnp.einsum('bj,bjn->bn', rot_y, pts) + t_y           # [B, npad]
    py = (v + 1.0) * (0.5 * (H - 1))
    perm = jnp.argsort(py, axis=-1)                          # [B, npad]
    inv_perm = jnp.argsort(perm, axis=-1)
    perm_b = jnp.broadcast_to(perm[:, None, :], (B, 3, npad))
    pts_sorted = jnp.take_along_axis(pts, perm_b, axis=2)
    py_sorted = jnp.take_along_axis(py, perm, axis=1).reshape(B, nt, n_tile)
    y_lo = jnp.floor(jnp.min(py_sorted, axis=-1))
    y_hi = jnp.floor(jnp.max(py_sorted, axis=-1)) + 1.0
    hmin = (jnp.clip(y_lo, 0.0, H - 1.0).astype(jnp.int32) // h_tile).reshape(B * nt)
    hmax = (jnp.clip(y_hi, 0.0, H - 1.0).astype(jnp.int32) // h_tile).reshape(B * nt)

    def feat_index(bb, nn, hh, cal, lo, hi):
        # Clamp into the occupied H range: skipped steps reuse the previously
        # fetched block (no DMA) and their compute is gated off in the kernel.
        hc = jnp.minimum(jnp.maximum(hh, lo[bb * nt + nn]), hi[bb * nt + nn])
        return (bb, 0, hc, 0)

    kernel = functools.partial(_pifu_query_kernel, H=H, c_chunk=c_chunk)
    out_sorted = pl.pallas_call(
        kernel,
        out_shape=jax.ShapeDtypeStruct((B, C, npad), out_dtype),
        grid_spec=pltpu.PrefetchScalarGridSpec(
            num_scalar_prefetch=3,
            grid=(B, nt, ht),
            in_specs=[
                pl.BlockSpec((None, 3, n_tile),
                             lambda bb, nn, hh, cal, lo, hi: (bb, 0, nn)),
                _feat_block_spec((None, C, h_tile, W), feat_index, feat_buffers),
            ],
            out_specs=pl.BlockSpec((None, C, n_tile),
                                   lambda bb, nn, hh, cal, lo, hi: (bb, 0, nn)),
            scratch_shapes=[
                pltpu.VMEM((1, n_tile), jnp.int32),     # global y0 (hoisted)
                pltpu.VMEM((1, n_tile), jnp.float32),   # wy1 (hoisted)
                pltpu.VMEM((W, n_tile), jnp.bfloat16),  # x one-hot (hoisted)
                pltpu.VMEM((C, n_tile), jnp.float32),   # accumulator
            ],
        ),
        compiler_params=pltpu.CompilerParams(
            dimension_semantics=("parallel", "parallel", "arbitrary"),
            vmem_limit_bytes=_vmem_limit_bytes(),
        ),
    )(calib_flat, hmin, hmax, pts_sorted, feat)

    # Undo the y-sort and strip padding.
    inv_b = jnp.broadcast_to(inv_perm[:, None, :], (B, C, npad))
    return jnp.take_along_axis(out_sorted, inv_b, axis=2)[:, :, :N]


# --------------------------------------------------------------------------
# shape_error_term == nn.MSELoss() — trivially memory-bound reduction; plain
# XLA is already at roofline so no Pallas kernel.
# --------------------------------------------------------------------------
def shape_error_mse(pred, label):
    return jnp.mean((pred.astype(jnp.float32) - label.astype(jnp.float32)) ** 2)


# --------------------------------------------------------------------------
# Pure-JAX reference for verification
# --------------------------------------------------------------------------
def reference_forward(points, images, calibs):
    B, C, H, W = images.shape
    rot = calibs[:, :, :3]
    trans = calibs[:, :, 3:]
    xyz = jnp.einsum('bij,bjn->bin', rot, points) + trans
    u, v = xyz[:, 0], xyz[:, 1]                      # [B, N]
    px = (u + 1.0) * 0.5 * (W - 1)
    py = (v + 1.0) * 0.5 * (H - 1)
    x0f = jnp.floor(px)
    y0f = jnp.floor(py)
    wx1, wy1 = px - x0f, py - y0f
    wx0, wy0 = 1.0 - wx1, 1.0 - wy1
    x0 = x0f.astype(jnp.int32)
    x1 = x0 + 1
    y0 = y0f.astype(jnp.int32)
    y1 = y0 + 1
    feat = images.reshape(B, C, H * W)

    def corner(xi, yi, w):
        valid = ((xi >= 0) & (xi <= W - 1) & (yi >= 0) & (yi <= H - 1)).astype(jnp.float32)
        flat = jnp.clip(yi, 0, H - 1) * W + jnp.clip(xi, 0, W - 1)
        idx = jnp.broadcast_to(flat[:, None, :], (B, C, flat.shape[1]))
        vals = jnp.take_along_axis(feat, idx, axis=2)
        return vals * (w * valid)[:, None, :]

    return (corner(x0, y0, wx0 * wy0) + corner(x1, y0, wx1 * wy0)
            + corner(x0, y1, wx0 * wy1) + corner(x1, y1, wx1 * wy1))


def _run_and_check(B, C, H, W, N, key, **fwd_kwargs):
    k1, k2, k3, k4 = jax.random.split(key, 4)
    images = jax.random.normal(k1, (B, C, H, W), jnp.float32)
    points = jax.random.uniform(k2, (B, 3, N), jnp.float32, minval=-1.0, maxval=1.0)
    rot = (0.8 * jnp.broadcast_to(jnp.eye(3, dtype=jnp.float32), (B, 3, 3))
           + 0.05 * jax.random.normal(k3, (B, 3, 3), jnp.float32))
    trans = 0.1 * jax.random.normal(k4, (B, 3, 1), jnp.float32)
    calibs = jnp.concatenate([rot, trans], axis=-1)            # [B, 3, 4]

    preds = jax.block_until_ready(pifu_forward(points, images, calibs, **fwd_kwargs))
    ref = reference_forward(points, images, calibs)
    assert preds.shape == (B, C, N)
    err = float(jnp.max(jnp.abs(preds.astype(jnp.float32) - ref)))
    # bf16 feature/weight quantization -> validate at the 1e-2 level
    assert err < 5e-2, f"pallas vs reference mismatch (max abs err {err})"
    return preds


if __name__ == "__main__":
    key = jax.random.PRNGKey(0)
    k_a, k_b, k_c = jax.random.split(key, 3)

    # Single-tile path (toy shapes).
    _run_and_check(B=2, C=4, H=16, W=16, N=8, key=k_a)

    # Multi-tile path: 2 N-tiles x 2 H-tiles x 2 C-chunks exercises the
    # accumulator, the H-tile skip (y-sorted points), the clamped data-
    # dependent feat index_map and the C-chunked matmul loop.
    _run_and_check(B=2, C=16, H=32, W=32, N=200, key=k_b,
                   n_tile=128, h_tile_target=16, c_chunk=8)

    # B == 1 path: wrapper forces >= 2 N-tiles (keeps both v7x TCs busy).
    _run_and_check(B=1, C=4, H=16, W=16, N=300, key=k_c)

    print("KERNEL_OK")
</pallas_src>

<mosaic_0001>
module attributes {stable_mosaic.version = 11 : i64} {
  func.func @_pifu_query_kernel(%arg0: i32, %arg1: i32, %arg2: i32, %arg3: memref<2x12xf32, #tpu.memory_space<smem>>, %arg4: memref<2xi32, #tpu.memory_space<smem>>, %arg5: memref<2xi32, #tpu.memory_space<smem>>, %arg6: memref<1x3x128xf32, #tpu.memory_space<vmem>>, %arg7: memref<1x4x16x16xbf16, #tpu.memory_space<vmem>>, %arg8: memref<1x4x128xf32, #tpu.memory_space<vmem>>, %arg9: memref<1x128xi32, #tpu.memory_space<vmem>>, %arg10: memref<1x128xf32, #tpu.memory_space<vmem>>, %arg11: memref<16x128xbf16, #tpu.memory_space<vmem>>, %arg12: memref<4x128xf32, #tpu.memory_space<vmem>>) attributes {dimension_semantics = [#tpu.dimension_semantics<parallel>, #tpu.dimension_semantics<parallel>, #tpu.dimension_semantics<arbitrary>], iteration_bounds = array<i64: 2, 1, 1>, scalar_prefetch = 3 : i64, scratch_operands = 4 : i64, tpu.core_type = #tpu.core_type<tc>, window_params = [{transform_indices = @transform_0, window_bounds = array<i64: 1, 3, 128>}, {transform_indices = @transform_1, window_bounds = array<i64: 1, 4, 16, 16>}, {transform_indices = @transform_2, window_bounds = array<i64: 1, 4, 128>}]} {
    %c0_i32 = arith.constant 0 : i32
    %0 = arith.cmpi eq, %arg2, %c0_i32 : i32
    %1 = arith.extui %0 : i1 to i32
    %c0_i32_0 = arith.constant 0 : i32
    %2 = arith.cmpi ne, %1, %c0_i32_0 : i32
    scf.if %2 {
      %c0 = arith.constant 0 : index
      %c0_4 = arith.constant 0 : index
      %c0_5 = arith.constant 0 : index
      %17 = vector.load %arg6[%c0, %c0_4, %c0_5] : memref<1x3x128xf32, #tpu.memory_space<vmem>>, vector<1x3x128xf32>
      %18 = vector.shape_cast %17 : vector<1x3x128xf32> to vector<3x128xf32>
      %19 = vector.extract_strided_slice %18 {offsets = [0, 0], sizes = [1, 128], strides = [1, 1]} : vector<3x128xf32> to vector<1x128xf32>
      %20 = vector.extract_strided_slice %18 {offsets = [1, 0], sizes = [1, 128], strides = [1, 1]} : vector<3x128xf32> to vector<1x128xf32>
      %21 = vector.extract_strided_slice %18 {offsets = [2, 0], sizes = [1, 128], strides = [1, 1]} : vector<3x128xf32> to vector<1x128xf32>
      %22 = arith.index_cast %arg0 : i32 to index
      %c0_6 = arith.constant 0 : index
      %23 = memref.load %arg3[%22, %c0_6] : memref<2x12xf32, #tpu.memory_space<smem>>
      %24 = vector.broadcast %23 : f32 to vector<1x128xf32>
      %25 = arith.mulf %24, %19 : vector<1x128xf32>
      %26 = arith.index_cast %arg0 : i32 to index
      %c1 = arith.constant 1 : index
      %27 = memref.load %arg3[%26, %c1] : memref<2x12xf32, #tpu.memory_space<smem>>
      %28 = vector.broadcast %27 : f32 to vector<1x128xf32>
      %29 = arith.mulf %28, %20 : vector<1x128xf32>
      %30 = arith.addf %25, %29 : vector<1x128xf32>
      %31 = arith.index_cast %arg0 : i32 to index
      %c2 = arith.constant 2 : index
      %32 = memref.load %arg3[%31, %c2] : memref<2x12xf32, #tpu.memory_space<smem>>
      %33 = vector.broadcast %32 : f32 to vector<1x128xf32>
      %34 = arith.mulf %33, %21 : vector<1x128xf32>
      %35 = arith.addf %30, %34 : vector<1x128xf32>
      %36 = arith.index_cast %arg0 : i32 to index
      %c3 = arith.constant 3 : index
      %37 = memref.load %arg3[%36, %c3] : memref<2x12xf32, #tpu.memory_space<smem>>
      %38 = vector.broadcast %37 : f32 to vector<1x128xf32>
      %39 = arith.addf %35, %38 : vector<1x128xf32>
      %40 = arith.index_cast %arg0 : i32 to index
      %c4 = arith.constant 4 : index
      %41 = memref.load %arg3[%40, %c4] : memref<2x12xf32, #tpu.memory_space<smem>>
      %42 = vector.broadcast %41 : f32 to vector<1x128xf32>
      %43 = arith.mulf %42, %19 : vector<1x128xf32>
      %44 = arith.index_cast %arg0 : i32 to index
      %c5 = arith.constant 5 : index
      %45 = memref.load %arg3[%44, %c5] : memref<2x12xf32, #tpu.memory_space<smem>>
      %46 = vector.broadcast %45 : f32 to vector<1x128xf32>
      %47 = arith.mulf %46, %20 : vector<1x128xf32>
      %48 = arith.addf %43, %47 : vector<1x128xf32>
      %49 = arith.index_cast %arg0 : i32 to index
      %c6 = arith.constant 6 : index
      %50 = memref.load %arg3[%49, %c6] : memref<2x12xf32, #tpu.memory_space<smem>>
      %51 = vector.broadcast %50 : f32 to vector<1x128xf32>
      %52 = arith.mulf %51, %21 : vector<1x128xf32>
      %53 = arith.addf %48, %52 : vector<1x128xf32>
      %54 = arith.index_cast %arg0 : i32 to index
      %c7 = arith.constant 7 : index
      %55 = memref.load %arg3[%54, %c7] : memref<2x12xf32, #tpu.memory_space<smem>>
      %56 = vector.broadcast %55 : f32 to vector<1x128xf32>
      %57 = arith.addf %53, %56 : vector<1x128xf32>
      %cst = arith.constant 1.000000e+00 : f32
      %58 = vector.broadcast %cst : f32 to vector<1x128xf32>
      %59 = arith.addf %39, %58 : vector<1x128xf32>
      %cst_7 = arith.constant 7.500000e+00 : f32
      %60 = vector.broadcast %cst_7 : f32 to vector<1x128xf32>
      %61 = arith.mulf %59, %60 : vector<1x128xf32>
      %cst_8 = arith.constant -2.000000e+00 : f32
      %cst_9 = arith.constant 1.700000e+01 : f32
      %62 = vector.broadcast %cst_8 : f32 to vector<1x128xf32>
      %63 = arith.maximumf %62, %61 : vector<1x128xf32>
      %64 = vector.broadcast %cst_9 : f32 to vector<1x128xf32>
      %65 = arith.minimumf %64, %63 : vector<1x128xf32>
      %cst_10 = arith.constant 1.000000e+00 : f32
      %66 = vector.broadcast %cst_10 : f32 to vector<1x128xf32>
      %67 = arith.addf %57, %66 : vector<1x128xf32>
      %cst_11 = arith.constant 7.500000e+00 : f32
      %68 = vector.broadcast %cst_11 : f32 to vector<1x128xf32>
      %69 = arith.mulf %67, %68 : vector<1x128xf32>
      %cst_12 = arith.constant -2.000000e+00 : f32
      %cst_13 = arith.constant 1.700000e+01 : f32
      %70 = vector.broadcast %cst_12 : f32 to vector<1x128xf32>
      %71 = arith.maximumf %70, %69 : vector<1x128xf32>
      %72 = vector.broadcast %cst_13 : f32 to vector<1x128xf32>
      %73 = arith.minimumf %72, %71 : vector<1x128xf32>
      %74 = math.floor %65 : vector<1x128xf32>
      %75 = arith.subf %65, %74 : vector<1x128xf32>
      %76 = arith.fptosi %74 : vector<1x128xf32> to vector<1x128xi32>
      %77 = tpu.iota {dimensions = array<i32: 0>} : vector<16x128xi32>
      %78 = vector.broadcast %76 : vector<1x128xi32> to vector<16x128xi32>
      %79 = arith.cmpi eq, %77, %78 : vector<16x128xi32>
      %cst_14 = arith.constant 1.000000e+00 : f32
      %80 = vector.broadcast %cst_14 : f32 to vector<1x128xf32>
      %81 = arith.subf %80, %75 : vector<1x128xf32>
      %c1_i32_15 = arith.constant 1 : i32
      %82 = vector.broadcast %c1_i32_15 : i32 to vector<1x128xi32>
      %83 = arith.addi %76, %82 : vector<1x128xi32>
      %84 = vector.broadcast %83 : vector<1x128xi32> to vector<16x128xi32>
      %85 = arith.cmpi eq, %77, %84 : vector<16x128xi32>
      %cst_16 = arith.constant 0.000000e+00 : f32
      %86 = vector.shape_cast %75 : vector<1x128xf32> to vector<1x128xf32>
      %87 = vector.broadcast %86 : vector<1x128xf32> to vector<16x128xf32>
      %88 = vector.broadcast %cst_16 : f32 to vector<16x128xf32>
      %89 = arith.select %85, %87, %88 : vector<16x128xi1>, vector<16x128xf32>
      %90 = vector.shape_cast %81 : vector<1x128xf32> to vector<1x128xf32>
      %91 = vector.broadcast %90 : vector<1x128xf32> to vector<16x128xf32>
      %92 = arith.select %79, %91, %89 : vector<16x128xi1>, vector<16x128xf32>
      %93 = arith.truncf %92 : vector<16x128xf32> to vector<16x128xbf16>
      %c0_17 = arith.constant 0 : index
      %c0_18 = arith.constant 0 : index
      %94 = vector.load %arg11[%c0_17, %c0_18] : memref<16x128xbf16, #tpu.memory_space<vmem>>, vector<16x128xbf16>
      tpu.vector_store %arg11[%c0_17, %c0_18], %93 {strides = array<i32>} : memref<16x128xbf16, #tpu.memory_space<vmem>>, vector<16x128xbf16>,
      %95 = math.floor %73 : vector<1x128xf32>
      %96 = arith.subf %73, %95 : vector<1x128xf32>
      %c0_19 = arith.constant 0 : index
      %c0_20 = arith.constant 0 : index
      %97 = vector.load %arg10[%c0_19, %c0_20] : memref<1x128xf32, #tpu.memory_space<vmem>>, vector<1x128xf32>
      tpu.vector_store %arg10[%c0_19, %c0_20], %96 {strides = array<i32>} : memref<1x128xf32, #tpu.memory_space<vmem>>, vector<1x128xf32>,
      %98 = arith.fptosi %95 : vector<1x128xf32> to vector<1x128xi32>
      %c0_21 = arith.constant 0 : index
      %c0_22 = arith.constant 0 : index
      %99 = vector.load %arg9[%c0_21, %c0_22] : memref<1x128xi32, #tpu.memory_space<vmem>>, vector<1x128xi32>
      tpu.vector_store %arg9[%c0_21, %c0_22], %98 {strides = array<i32>} : memref<1x128xi32, #tpu.memory_space<vmem>>, vector<1x128xi32>,
      %cst_23 = arith.constant 0.000000e+00 : f32
      %100 = vector.broadcast %cst_23 : f32 to vector<4x128xf32>
      %c0_24 = arith.constant 0 : index
      %c0_25 = arith.constant 0 : index
      %101 = vector.load %arg12[%c0_24, %c0_25] : memref<4x128xf32, #tpu.memory_space<vmem>>, vector<4x128xf32>
      tpu.vector_store %arg12[%c0_24, %c0_25], %100 {strides = array<i32>} : memref<4x128xf32, #tpu.memory_space<vmem>>, vector<4x128xf32>,
    } else {
    }
    %c1_i32 = arith.constant 1 : i32
    %3 = arith.muli %arg0, %c1_i32 : i32
    %4 = arith.addi %3, %arg1 : i32
    %5 = arith.index_cast %4 : i32 to index
    %6 = memref.load %arg4[%5] : memref<2xi32, #tpu.memory_space<smem>>
    %7 = arith.index_cast %4 : i32 to index
    %8 = memref.load %arg5[%7] : memref<2xi32, #tpu.memory_space<smem>>
    %9 = arith.cmpi sge, %arg2, %6 : i32
    %10 = arith.cmpi sle, %arg2, %8 : i32
    %11 = arith.andi %9, %10 : i1
    %12 = arith.extui %11 : i1 to i32
    %c0_i32_1 = arith.constant 0 : i32
    %13 = arith.cmpi ne, %12, %c0_i32_1 : i32
    scf.if %13 {
      %c0 = arith.constant 0 : index
      %c0_4 = arith.constant 0 : index
      %17 = vector.load %arg9[%c0, %c0_4] : memref<1x128xi32, #tpu.memory_space<vmem>>, vector<1x128xi32>
      %c16_i32 = arith.constant 16 : i32
      %18 = arith.muli %arg2, %c16_i32 : i32
      %19 = vector.broadcast %18 : i32 to vector<1x128xi32>
      %20 = arith.subi %17, %19 : vector<1x128xi32>
      %c0_5 = arith.constant 0 : index
      %c0_6 = arith.constant 0 : index
      %21 = vector.load %arg10[%c0_5, %c0_6] : memref<1x128xf32, #tpu.memory_space<vmem>>, vector<1x128xf32>
      %22 = tpu.iota {dimensions = array<i32: 0>} : vector<16x128xi32>
      %23 = vector.broadcast %20 : vector<1x128xi32> to vector<16x128xi32>
      %24 = arith.cmpi eq, %22, %23 : vector<16x128xi32>
      %cst = arith.constant 1.000000e+00 : f32
      %25 = vector.broadcast %cst : f32 to vector<1x128xf32>
      %26 = arith.subf %25, %21 : vector<1x128xf32>
      %c1_i32_7 = arith.constant 1 : i32
      %27 = vector.broadcast %c1_i32_7 : i32 to vector<1x128xi32>
      %28 = arith.addi %20, %27 : vector<1x128xi32>
      %29 = vector.broadcast %28 : vector<1x128xi32> to vector<16x128xi32>
      %30 = arith.cmpi eq, %22, %29 : vector<16x128xi32>
      %cst_8 = arith.constant 0.000000e+00 : f32
      %31 = vector.shape_cast %21 : vector<1x128xf32> to vector<1x128xf32>
      %32 = vector.broadcast %31 : vector<1x128xf32> to vector<16x128xf32>
      %33 = vector.broadcast %cst_8 : f32 to vector<16x128xf32>
      %34 = arith.select %30, %32, %33 : vector<16x128xi1>, vector<16x128xf32>
      %35 = vector.shape_cast %26 : vector<1x128xf32> to vector<1x128xf32>
      %36 = vector.broadcast %35 : vector<1x128xf32> to vector<16x128xf32>
      %37 = arith.select %24, %36, %34 : vector<16x128xi1>, vector<16x128xf32>
      %38 = vector.shape_cast %37 : vector<16x128xf32> to vector<1x16x128xf32>
      %c0_9 = arith.constant 0 : index
      %c0_10 = arith.constant 0 : index
      %39 = vector.load %arg11[%c0_9, %c0_10] : memref<16x128xbf16, #tpu.memory_space<vmem>>, vector<16x128xbf16>
      %c0_11 = arith.constant 0 : index
      %c0_12 = arith.constant 0 : index
      %c0_13 = arith.constant 0 : index
      %c0_14 = arith.constant 0 : index
      %40 = vector.load %arg7[%c0_11, %c0_12, %c0_13, %c0_14] : memref<1x4x16x16xbf16, #tpu.memory_space<vmem>>, vector<1x4x16x16xbf16>
      %41 = vector.shape_cast %40 : vector<1x4x16x16xbf16> to vector<4x16x16xbf16>
      %42 = vector.shape_cast %41 : vector<4x16x16xbf16> to vector<64x16xbf16>
      %cst_15 = arith.constant dense<0.000000e+00> : vector<64x128xf32>
      %43 = tpu.matmul %42, %39, %cst_15 {dimension_numbers = #tpu.dot_dimension_numbers<[1], [0], [0], [1], [0, 0, 1, 1], [], []>} : vector<64x16xbf16>, vector<16x128xbf16>, vector<64x128xf32> -> vector<64x128xf32>
      %44 = vector.shape_cast %43 : vector<64x128xf32> to vector<4x16x128xf32>
      %c0_16 = arith.constant 0 : index
      %c0_17 = arith.constant 0 : index
      %45 = vector.load %arg12[%c0_16, %c0_17] : memref<4x128xf32, #tpu.memory_space<vmem>>, vector<4x128xf32>
      %46 = vector.broadcast %38 : vector<1x16x128xf32> to vector<4x16x128xf32>
      %47 = arith.mulf %44, %46 : vector<4x16x128xf32>
      %cst_18 = arith.constant dense<0.000000e+00> : vector<4x128xf32>
      %48 = vector.multi_reduction <add>, %47, %cst_18 [1] : vector<4x16x128xf32> to vector<4x128xf32>
      %49 = arith.addf %45, %48 : vector<4x128xf32>
      %c0_19 = arith.constant 0 : index
      %c0_20 = arith.constant 0 : index
      %50 = vector.load %arg12[%c0_19, %c0_20] : memref<4x128xf32, #tpu.memory_space<vmem>>, vector<4x128xf32>
      tpu.vector_store %arg12[%c0_19, %c0_20], %49 {strides = array<i32>} : memref<4x128xf32, #tpu.memory_space<vmem>>, vector<4x128xf32>,
    } else {
    }
    %c0_i32_2 = arith.constant 0 : i32
    %14 = arith.cmpi eq, %arg2, %c0_i32_2 : i32
    %15 = arith.extui %14 : i1 to i32
    %c0_i32_3 = arith.constant 0 : i32
    %16 = arith.cmpi ne, %15, %c0_i32_3 : i32
    scf.if %16 {
      %c0 = arith.constant 0 : index
      %c0_4 = arith.constant 0 : index
      %17 = vector.load %arg12[%c0, %c0_4] : memref<4x128xf32, #tpu.memory_space<vmem>>, vector<4x128xf32>
      %c0_5 = arith.constant 0 : index
      %c0_6 = arith.constant 0 : index
      %c0_7 = arith.constant 0 : index
      %18 = vector.load %arg8[%c0_5, %c0_6, %c0_7] : memref<1x4x128xf32, #tpu.memory_space<vmem>>, vector<1x4x128xf32>
      %19 = vector.shape_cast %18 : vector<1x4x128xf32> to vector<4x128xf32>
      %20 = vector.shape_cast %17 : vector<4x128xf32> to vector<1x4x128xf32>
      tpu.vector_store %arg8[%c0_5, %c0_6, %c0_7], %20 {strides = array<i32>} : memref<1x4x128xf32, #tpu.memory_space<vmem>>, vector<1x4x128xf32>,
    } else {
    }
    return
  }
  func.func @transform_0(%arg0: i32, %arg1: i32, %arg2: i32, %arg3: memref<2x12xf32, #tpu.memory_space<smem>>, %arg4: memref<2xi32, #tpu.memory_space<smem>>, %arg5: memref<2xi32, #tpu.memory_space<smem>>) -> (i32, i32, i32) {
    %c0_i32 = arith.constant 0 : i32
    %c0_i32_0 = arith.constant 0 : i32
    return %arg0, %c0_i32, %arg1 : i32, i32, i32
  }
  func.func @transform_1(%arg0: i32, %arg1: i32, %arg2: i32, %arg3: memref<2x12xf32, #tpu.memory_space<smem>>, %arg4: memref<2xi32, #tpu.memory_space<smem>>, %arg5: memref<2xi32, #tpu.memory_space<smem>>) -> (i32, i32, i32, i32) {
    %c1_i32 = arith.constant 1 : i32
    %0 = arith.muli %arg0, %c1_i32 : i32
    %1 = arith.addi %0, %arg1 : i32
    %2 = arith.index_cast %1 : i32 to index
    %3 = memref.load %arg4[%2] : memref<2xi32, #tpu.memory_space<smem>>
    %4 = arith.maxsi %arg2, %3 : i32
    %c1_i32_0 = arith.constant 1 : i32
    %5 = arith.muli %arg0, %c1_i32_0 : i32
    %6 = arith.addi %5, %arg1 : i32
    %7 = arith.index_cast %6 : i32 to index
    %8 = memref.load %arg5[%7] : memref<2xi32, #tpu.memory_space<smem>>
    %9 = arith.minsi %4, %8 : i32
    %c0_i32 = arith.constant 0 : i32
    %c0_i32_1 = arith.constant 0 : i32
    %c0_i32_2 = arith.constant 0 : i32
    return %arg0, %c0_i32, %9, %c0_i32_1 : i32, i32, i32, i32
  }
  func.func @transform_2(%arg0: i32, %arg1: i32, %arg2: i32, %arg3: memref<2x12xf32, #tpu.memory_space<smem>>, %arg4: memref<2xi32, #tpu.memory_space<smem>>, %arg5: memref<2xi32, #tpu.memory_space<smem>>) -> (i32, i32, i32) {
    %c0_i32 = arith.constant 0 : i32
    %c0_i32_0 = arith.constant 0 : i32
    return %arg0, %c0_i32, %arg1 : i32, i32, i32
  }
}

</mosaic_0001>

<bundles_post_ra>
// kernel: tpu_custom_call.1
= control target key start
LH: loop header
LB: loop body
LE: loop exit
PB: predicated region body
PF: predicated region fallthrough
CT: control target
= control target key end

     0   :  { %s985_s24 = smov [#allocation7]   ;;  %s986_s25 = smov [#allocation8]   ;;  %s1250_s0 = inlined_call_operand.vmem [shape: f32[2,12], index: 0, kind: input, shape index: {}]   ;;  %s1251_s3 = inlined_call_operand.vmem [shape: f32[2,3,128], index: 3, kind: input, shape index: {}]   ;;  %s1252_s4 = inlined_call_operand.hbm [shape: bf16[2,4,16,16], index: 4, kind: input, shape index: {}]   ;;  %s1253_s5 = inlined_call_operand.hbm [shape: f32[2,4,128], index: 5, kind: output, shape index: {}]   ;;  %s1254_s1 = inlined_call_operand.vmem [shape: s32[2], index: 1, kind: input, shape index: {}]   ;;  %s1255_s2 = inlined_call_operand.vmem [shape: s32[2], index: 2, kind: input, shape index: {}]  }
   0x1   :  { %s11_s20 = sshll.u32 %s1250_s0, 4  ;;  %s16_s23 = sshll.u32 %s1254_s1, 4  ;;  %s12_s20 = int_to_ptr.vmem [resolvable:$true] %s11_s20  ;;  %s17_s23 = int_to_ptr.vmem [resolvable:$true] %s16_s23 }
   0x2   :  { %14 = dma.vmem_to_smem %s12_s20, 32, %s985_s24, [#allocation6] }
   0x3   :  { %19 = dma.vmem_to_smem %s17_s23, 16, %s986_s25, [#allocation6] }
   0x4   :  { %s21_s28 = sshll.u32 %s1255_s2, 4  ;;  %s987_s29 = smov [#allocation9]   ;;  %s22_s28 = int_to_ptr.vmem [resolvable:$true] %s21_s28 }
   0x5   :  { %24 = dma.vmem_to_smem %s22_s28, 16, %s987_s29, [#allocation6] }
   0x6   :  { %939 = dma.done.wait [#allocation6], 64 }
   0x7   :  { %940 = vsyncadd [#allocation6], 4294967232 }
   0x8   :  { %27 = sfence }
   0x9   :  { %28 = vsyncpa [#allocation11], 0 }
   0xa   :  { %30 = vsyncpa [#allocation11 + $0x1], 0 }
   0xb   :  { %31 = vsyncpa [#allocation12], 0 }
   0xc   :  { %33 = vsyncpa [#allocation12 + $0x1], 0  ;;  %s1030_s0 = smov 0   ;;  %s1032_s1 = smov 0  }
   0xd   :  { %s1034_s30 = smov 0   ;;  %s1036_s6 = smov 0  }
   0xe   :  { %s1038_s7 = smov 0   ;;  %s1040_s2 = smov 0  }
   0xf   :  { %s1042_s8 = smov 0   ;;  %s1044_s9 = smov 0  }
  0x10   :  { %s1046_s10 = smov 0  }
  0x11 LB: > { %1259 = sst [smem:[#allocation21_spill]] %s971_s2  ;;  %s58_s11 = sadd.s32 1, %s979_s9  ;;  %s983_s10 = sphi %s1046_s10, %s39_s10   ;;  %s979_s9 = sphi %s1044_s9, %s1274_s9   ;;  %s975_s8 = sphi %s1042_s8, %s1273_s8   ;;  %s971_s2 = sphi %s1040_s2, %s1272_s2   ;;  %s967_s7 = sphi %s1038_s7, %s1279_s7   ;;  %s963_s6 = sphi %s1036_s6, %s1278_s6   ;;  %s959_s30 = sphi %s1034_s30, %s1277_s30   ;;  %s955_s1 = sphi %s1032_s1, %s1276_s1   ;;  %s951_s0 = sphi %s1030_s0, %s1275_s0  }
  0x12   : > { %1260 = sst [smem:[#allocation22_spill]] %s979_s9  ;;  %s644_s13 = sadd.s32 4294967295, %s983_s10  }
  0x13   : > { %s91_s12 = sld [smem:[#allocation8 + %s979_s9]]  ;;  %p60_p0 = scmp.ge.s32.totalorder %s58_s11, 2 }
  0x14   : > { %s645_s14 = sadd.s32 4294967294, %s983_s10   ;;  %s94_s15 = sld [smem:[#allocation9 + %s979_s9]] }
  0x15   : > { %s1281_s11 = smov (%p60_p0, %s58_s11), 0  ;;  %p116_p1 = scmp.ne.s32.totalorder %s971_s2, %s967_s7 }
  0x16   : > { %1261 = sst [smem:[#allocation23_spill]] %s1281_s11  ;;  %p117_p2 = scmp.eq.s32.totalorder %s983_s10, 0 }
  0x17   : > { %s98_s16 = sld [smem:[#allocation8 + %s1281_s11]]  ;;  %p122_p3 = scmp.ne.s32.totalorder %s967_s7, %s963_s6 }
  0x18   : > { %s104_s17 = ssub.s32 %s979_s9, %s1281_s11  ;;  %s101_s18 = sld [smem:[#allocation9 + %s1281_s11]] }
  0x19   : > { %p646_p4 = scmp.lt.s32.totalorder %s91_s12, 0  ;;  %p123_p5 = scmp.eq.s32.totalorder %s644_s13, 0 }
  0x1a   : > { %p135_p7 = scmp.eq.s32.totalorder %s104_s17, 0  ;;  %s137_s20 = sadd.s32 1, %s959_s30 }
  0x1b   : > { %s1283_s12 = smov (%p646_p4, %s91_s12), 0  ;;  %p1088_p6 = por %p123_p5, %p122_p3 }
  0x1c   : > { %p95_p8 = scmp.lt.s32.totalorder %s1283_s12, %s94_s15  ;;  %p147_p10 = scmp.ne.s32.totalorder %s959_s30, %s955_s1 }
  0x1d   : > { %p647_p9 = scmp.lt.s32.totalorder %s98_s16, 0  ;;  %p148_p12 = scmp.eq.s32.totalorder %s644_s13, 1 }
  0x1e   : > { %s1285_s12 = smov (!%p95_p8, %s1283_s12), %s94_s15  ;;  %p153_p13 = scmp.ne.s32.totalorder %s955_s1, %s951_s0 }
  0x1f   : > { %s1287_s16 = smov (%p647_p9, %s98_s16), 0  ;;  %p154_p0 = scmp.eq.s32.totalorder %s645_s14, 1 }
  0x20   : > { %s1096_s21 = scalar_select %p135_p7, %s959_s30, %s137_s20  }
  0x21   : > { %p102_p11 = scmp.lt.s32.totalorder %s1287_s16, %s101_s18  ;;  %p1100_p3 = por %p148_p12, %p147_p10 }
  0x22   : > { %1263 = sst [smem:[#allocation24_spill]] %s1096_s21  ;;  %p1104_p4 = por %p154_p0, %p153_p13 }
  0x23   : > { %s1289_s16 = smov (!%p102_p11, %s1287_s16), %s101_s18  ;;  %p649_p5 = scmp.ge.s32.totalorder %s983_s10, 2 }
  0x24   : > { %s105_s24 = ssub.s32 %s1285_s12, %s1289_s16  ;;  %s109_s26 = sadd.s32 1, %s971_s2 }
  0x25   : > { %s106_s25 = sor.u32 %s105_s24, %s104_s17  ;;  %p118_p8 = por %p117_p2, %p116_p1 }
  0x26   : > { %p107_p7 = scmp.eq.s32.totalorder %s106_s25, 0  ;;  %p727_p9 = scmp.lt.s32.totalorder %s983_s10, 2 }
  0x27   : > { %s707_s28 = scalar_select %p118_p8, [#allocation8], [#allocation14] }
  0x28   : > { %s1117_s27 = scalar_select %p107_p7, %s971_s2, %s109_s26  }
  0x29   : > { %s708_s29 = scalar_select %p118_p8, %s979_s9, 0 }
  0x2a   : > { %1266 = sst [smem:[#allocation25_spill]] %s1117_s27  ;;  %s1291_s28 = smov (!%p727_p9, %s707_s28), [#allocation16] }
  0x2b   : > { %s1293_s29 = smov (!%p727_p9, %s708_s29), 0  ;;  %s184_s13 = sand.u32 1, %s971_s2  }
  0x2c   : > { %s709_s6 = scalar_select %p118_p8, [#allocation9], [#allocation15] }
  0x2d   : > { %s190_s12 = sld [smem:[%s1291_s28 + %s1293_s29]]  ;;  %p1121_p10 = pnand %p727_p9, %p118_p8 }
  0x2e   : > { %s1295_s6 = smov (!%p727_p9, %s709_s6), [#allocation17]  ;;  %s650_s16 = sshll.u32 %s184_s13, 5 }
  0x2f   : > { %s193_s15 = sld [smem:[%s1295_s6 + %s1293_s29]]  ;;  %p655_p11 = scmp.ge.s32.totalorder %s983_s10, 1 }
  0x30   : > { %p213_p1 = scmp.lt.s32.totalorder %s983_s10, 3  ;;  %s653_s18 = sshll.u32 %s979_s9, 3 }
  0x31   : > { %s188_s20 = scalar_lea.vmem [#allocation10], %s650_s16  ;;  %s185_s2 = scalar_lea.sflag [#allocation11], %s184_s13 }
  0x32   : > { %p1127_p12 = pnand %p655_p11, %p213_p1  ;;  %s1132_s24 = sshll.u32 %s188_s20, 4  ;;  %s206_s24 = int_to_ptr.vmem [resolvable:$true] %s1132_s24 }
  0x33   : > { %p651_p2 = scmp.lt.s32.totalorder %s190_s12, 0  ;;  %p849_p7 = pneg %p1121_p10 }
  0x34   : > { %s852_s16 = scalar_lea.hbm %s1252_s4, 64 }
  0x35   : > { %s1297_s12 = smov (%p651_p2, %s190_s12), 0 }
  0x36   : > { %p194_p13 = scmp.lt.s32.totalorder %s1297_s12, %s193_s15 }
  0x38   : > { %s1299_s12 = smov (!%p194_p13, %s1297_s12), %s193_s15 }
  0x39   : > { %s652_s25 = sshll.u32 %s1299_s12, 1 }
  0x3a   : > { %s200_s26 = sadd.s32 %s653_s18, %s652_s25 }
  0x3b   : > { %s654_s28 = sshll.u32 %s200_s26, 2 }
  0x3c   : > { %s202_s11 = scalar_lea.hbm %s1252_s4, %s654_s28 }
  0x3d   : > { %s203_s27 = sshll.u32 %s202_s11, 4  ;;  %s204_s27 = int_to_ptr.hbm [resolvable:$true] %s203_s27 }
  0x3e   : > { %s845_s21 = sshra.s32 %s204_s27, 4  ;;  %s846_s21 = int_to_ptr.hbm [resolvable:$true] %s845_s21 }
  0x3f   : > { %s847_s9 = scalar_lea.hbm %s846_s21, 32  ;;  %p853_p11 = scmp.lt.s32.totalorder %s846_s21, %s1252_s4 }
  0x40   : > { %p848_p0 = scmp.ne.s32.totalorder %s846_s21, %s847_s9  ;;  %p854_p1 = scmp.lt.s32.totalorder %s852_s16, %s847_s9 }
  0x42   : > { %p850_p8 = pnand %p849_p7, %p848_p0  ;;  %p855_p2 = por %p854_p1, %p853_p11 }
  0x44   : > { %p851_p9 = pneg %p850_p8 }
  0x46   : > { %p856_p13 = pnand %p855_p2, %p851_p9 }
  0x48   : > { %859 = shalt.err (!%p856_p13)
}
  0x49   : > { %s988_s11 = smov 64   ;;  %s989_s13 = smov 4  }
  0x4a   : > { %722 = dma.hbm_to_vmem [thread:$0]  (!%p1121_p10), %s204_s27, 512, %s206_s24, %s185_s2, %s988_s11, %s988_s11, %s989_s13  }
  0x4b   : > { %217 = sbr.rel (%p1127_p12) target bundleno = 312 (0x138), region = 28  ;;  %s219_s25 = sand.u32 (!%p1127_p12), 1, %s967_s7  }
  0x4c   : > { %s656_s26 = sshll.u32 (!%p1127_p12), %s219_s25, 5  ;;  %s220_s28 = scalar_lea.sflag (!%p1127_p12), [#allocation11], %s219_s25 }
  0x4d   : > { %s1151_s29 = scalar_lea.vmem (!%p1127_p12), [#allocation10], %s656_s26 }
  0x50   : > { %942 = dma.done.wait (%p1088_p6), %s220_s28, 512  }
  0x51   : > { %944 = vsyncadd (%p1088_p6), %s220_s28, 4294966784  ;;  %s249_s2 = sand.u32 1, %s955_s1   ;;  %p252_p10 = scmp.lt.s32.totalorder %s975_s8, 1  ;;  %v990_v3 = vmov 0.0   ;;  %v332_v27 = vlaneseq }
  0x52   : > { %s360_s9 = sld [smem:[#allocation8 + %s975_s8]]  ;;  %s1162_s21 = sshll.u32 %s249_s2, 2  ;;  %358 = vst [vmem:[#allocation5] sm:$0xf] %v990_v3 }
  0x53   : > { %s361_s27 = sld [smem:[#allocation9 + %s975_s8]]  ;;  %s1167_s17 = sshll.u32 %s975_s8, 7  ;;  %v1184_v32 = vshrl.u32 %v332_v27, 7 }
  0x54   : > { %s253_s14 = scalar_select %p252_p10, %s975_s8, 1 }
  0x55   : > { %s274_s24 = sld [smem:[#allocation7 + %s1167_s17]]  ;;  %s277_s16 = sadd.s32 1, %s1167_s17  ;;  %v334_v38 = vadd.s32 8, %v1184_v32 }
  0x56   : > { %s658_s19 = sshll.u32 %s253_s14, 2  ;;  %s278_s18 = sld [smem:[#allocation7 + %s277_s16]] }
  0x57   : > { %s258_s12 = scalar_lea.vmem %s1251_s3, %s658_s19  ;;  %s285_s20 = sadd.s32 2, %s1167_s17 }
  0x58   : > { %p660_p6 = scmp.le.s32.totalorder %s360_s9, 0  ;;  %s286_s11 = sld [smem:[#allocation7 + %s285_s20]]  ;;  %v272_v0 = vld [vmem:[%s258_s12] sm:$0x7] }
  0x59   : > { %p661_p12 = scmp.ge.s32.totalorder %s361_s27, 0  ;;  %s293_s13 = sadd.s32 3, %s1167_s17 }
  0x5a   : > { %s294_s26 = sld [smem:[#allocation7 + %s293_s13]]  ;;  %s297_s28 = sadd.s32 4, %s1167_s17 }
  0x5b   : > { %p1176_p0 = pnand %p661_p12, %p660_p6  ;;  %v275_v1 = vstv %s274_s24  ;;  %s301_s14 = sadd.s32 5, %s1167_s17 }
  0x5c   : > { %s298_s6 = sld [smem:[#allocation7 + %s297_s28]]  ;;  %s309_s15 = sadd.s32 6, %s1167_s17  ;;  %v279_v2 = vstv %s278_s18  ;;  %v276_v4 = vmul.f32 %v275_v1, %v272_v0 }
  0x5d   : > { %s302_s19 = sld [smem:[#allocation7 + %s301_s14]]  ;;  %v280_v5 = vmul.f32 %v279_v2, %v272_v0  ;;  %s317_s27 = sadd.s32 7, %s1167_s17 }
  0x5e   : > { %s310_s9 = sld [smem:[#allocation7 + %s309_s15]]  ;;  %v287_v6 = vstv %s286_s11  ;;  %s251_s17 = scalar_lea.vmem [#allocation13], %s1162_s21 }
  0x5f   : > { %v282_v7 = vrot.slane %v280_v5, 1  ;;  %v288_v8 = vmul.f32 %v287_v6, %v272_v0  ;;  %s318_s16 = sld [smem:[#allocation7 + %s317_s27]] }
  0x60   : > { %v295_v12 = vstv %s294_s26 }
  0x61   : > { %v284_v9 = vadd.f32 %v282_v7, %v276_v4  ;;  %v290_v10 = vrot.slane %v288_v8, 2 }
  0x62   : > { %v299_v11 = vstv %s298_s6 }
  0x63   : > { %v303_v13 = vstv %s302_s19  ;;  %v292_v14 = vadd.f32 %v290_v10, %v284_v9  ;;  %v300_v15 = vmul.f32 %v299_v11, %v272_v0 }
  0x64   : > { %v304_v16 = vmul.f32 %v303_v13, %v272_v0  ;;  %v311_v17 = vstv %s310_s9 }
  0x65   : > { %v312_v18 = vmul.f32 %v311_v17, %v272_v0  ;;  %v296_v19 = vadd.f32 %v295_v12, %v292_v14  ;;  %v319_v24 = vstv %s318_s16 }
  0x66   : > { %v306_v20 = vrot.slane %v304_v16, 1 }
  0x67   : > { %v314_v21 = vrot.slane %v312_v18, 2  ;;  %v321_v22 = vadd.f32 1.0, %v296_v19 }
  0x68   : > { %v308_v23 = vadd.f32 %v306_v20, %v300_v15 }
  0x69   : > { %v322_v25 = vmul.f32 7.5, %v321_v22 }
  0x6a   : > { %v316_v26 = vadd.f32 %v314_v21, %v308_v23 }
  0x6b   : > { %v323_v28 = vmax.f32 %v322_v25, -2.0 }
  0x6c   : > { %v320_v29 = vadd.f32 %v319_v24, %v316_v26 }
  0x6d   : > { %v324_v30 = vmin.f32 %v323_v28, 17.0 }
  0x6e   : > { %v325_v31 = vadd.f32 1.0, %v320_v29 }
  0x6f   : > { %v329_v33 = vfloor.f32 %v324_v30 }
  0x70   : > { %v326_v34 = vmul.f32 7.5, %v325_v31 }
  0x71   : > { %v330_v35 = vsub.f32 %v324_v30, %v329_v33  ;;  %v704_v36 = vcvt.f32.s32 %v329_v33 }
  0x72   : > { %v327_v37 = vmax.f32 %v326_v34, -2.0 }
  0x73   : > { %v335_v39 = vperm.slane %v704_v36, 0  ;;  %v338_v40 = vsub.f32 1.0, %v330_v35  ;;  %v339_v41 = vadd.s32 1, %v704_v36  ;;  %v343_v42 = vperm.slane %v330_v35, 0 }
  0x74   : > { %v328_v43 = vmin.f32 %v327_v37, 17.0 }
  0x75   : > { %v340_v44 = vperm.slane %v339_v41, 0  ;;  %v346_v45 = vperm.slane %v338_v40, 0  ;;  %vm336_vm0 = vcmp.eq.s32.totalorder %v1184_v32, %v335_v39  ;;  %vm337_vm1 = vcmp.eq.s32.totalorder %v334_v38, %v335_v39 }
  0x76   : > { %v353_v46 = vfloor.f32 %v328_v43 }
  0x77   : > { %vm341_vm2 = vcmp.eq.s32.totalorder %v1184_v32, %v340_v44  ;;  %vm342_vm3 = vcmp.eq.s32.totalorder %v334_v38, %v340_v44 }
  0x78   : > { %v344_v47 = vsel %vm341_vm2, %v343_v42, 0.0  ;;  %v345_v48 = vsel %vm342_vm3, %v343_v42, 0.0  ;;  %v354_v49 = vsub.f32 %v328_v43, %v353_v46  ;;  %v706_v50 = vcvt.f32.s32 %v353_v46  ;;  %367 = sbr.rel (%p1176_p0) target bundleno = 297 (0x129), region = 40 }
  0x79   : > { %v347_v51 = vsel %vm336_vm0, %v346_v45, %v344_v47  ;;  %v348_v52 = vsel %vm337_vm1, %v346_v45, %v345_v48 }
  0x7a   : > { %v698_v53 = vpack.c.bf16 %v348_v52, %v347_v51  ;;  %355 = vst [vmem:[#allocation3] sm:$0x1] %v354_v49 }
  0x7b   : > { %357 = vst [vmem:[#allocation2] sm:$0x1] %v706_v50 }
  0x7c   : > { %699 = vst [vmem:[#allocation4] sm:$0xff] %v698_v53  }
  0x7d   : > { %v691_v55 = vld [vmem:[%s1151_s29] sm:$0xff]  ;;  %v692_v56 = vld [vmem:[%s1151_s29 + $0x8] sm:$0xff]  ;;  %vm430_vm4 = vcmask 130048   ;;  %v693_v57 = vld [vmem:[%s1151_s29 + $0x10] sm:$0xff]  ;;  %vm513_vm9 = vcmask 1041409   ;;  %vm515_vm10 = vcmask 1042434  }
  0x7e   : > { %v694_v58 = vld [vmem:[%s1151_s29 + $0x18] sm:$0xff]  ;;  %vm517_vm11 = vcmask 1043459  }
  0x7f   : > { %v472_v52 = vld [vmem:[#allocation5] sm:$0xf] }
  0x81   : > { %v372_v61 = vld [vmem:[#allocation3] sm:$0x1] }
  0x82   : > { %v368_v59 = vld [vmem:[#allocation2] sm:$0x1]  ;;  %v379_v63 = vsub.f32 1.0, %v372_v61  ;;  %v808_v1 = vld [vmem:[#allocation3] ss:$0 sm:$0xff] }
  0x83   : > { %v690_v54 = vld [vmem:[#allocation4] sm:$0xff]  ;;  %v380_v60 = vadd.s32 1, %v368_v59  ;;  %v807_v0 = vld [vmem:[#allocation2] ss:$0 sm:$0xff] }
  0x84   : > { %450 = vmatpush.bf16.msra.mxu0 %v690_v54  ;;  %700 = vmatpush.bf16.msra.mxu1 %v690_v54  ;;  %v390_v4 = vperm.slane %v379_v63, 0  ;;  %vm377_vm7 = vcmp.eq.s32.totalorder %v1184_v32, %v807_v0  ;;  %vm378_vm8 = vcmp.eq.s32.totalorder %v334_v38, %v807_v0 }
  0x85   : > { %701 = vmatpush.bf16.msra.mxu2 %v690_v54  ;;  %702 = vmatpush.bf16.msra.mxu3 %v690_v54  ;;  %v381_v62 = vperm.slane %v380_v60, 0 }
  0x87   : > { %682 = vmatmul.msk.bf16.vlgmr.msra.gmra.mxu0 %vm430_vm4, %v691_v55  ;;  %683 = vmatmul.msk.bf16.vlgmr.msra.gmra.mxu1 %vm430_vm4, %v692_v56  ;;  %vm382_vm5 = vcmp.eq.s32.totalorder %v1184_v32, %v381_v62  ;;  %vm383_vm6 = vcmp.eq.s32.totalorder %v334_v38, %v381_v62 }
  0x88   : > { %684 = vmatmul.msk.bf16.vlgmr.msra.gmra.mxu2 %vm430_vm4, %v693_v57  ;;  %685 = vmatmul.msk.bf16.vlgmr.msra.gmra.mxu3 %vm430_vm4, %v694_v58  ;;  %v387_v5 = vsel %vm382_vm5, %v808_v1, 0.0  ;;  %v388_v6 = vsel %vm383_vm6, %v808_v1, 0.0 }
  0x89   : > { %v392_v7 = vsel %vm377_vm7, %v390_v4, %v387_v5  ;;  %v393_v8 = vsel %vm378_vm8, %v390_v4, %v388_v6 }
 0x104   : > { %v452_v2 = vpop.f32.mrf.mxu0  ;;  %v457_v3 = vpop.f32.mrf.mxu1 }
 0x105   : > { %v473_v13 = vmul.f32 %v452_v2, %v392_v7  ;;  %v475_v14 = vmul.f32 %v457_v3, %v392_v7 }
 0x10b   : > { %v462_v9 = vpop.f32.mrf.mxu2  ;;  %v467_v10 = vpop.f32.mrf.mxu3 }
 0x10c   : > { %v454_v11 = vpop.f32.mrf.mxu0  ;;  %v459_v12 = vpop.f32.mrf.mxu1  ;;  %v477_v25 = vmul.f32 %v462_v9, %v392_v7  ;;  %v479_v26 = vmul.f32 %v467_v10, %v392_v7 }
 0x10d   : > { %v474_v15 = vmul.f32 %v454_v11, %v393_v8  ;;  %v476_v16 = vmul.f32 %v459_v12, %v393_v8 }
 0x10f   : > { %v481_v17 = vadd.f32 %v474_v15, %v473_v13  ;;  %v488_v18 = vadd.f32 %v476_v16, %v475_v14 }
 0x111   : > { %v482_v19 = vrot.slane %v481_v17, 4  ;;  %v489_v20 = vrot.slane %v488_v18, 4 }
 0x113   : > { %v483_v21 = vadd.f32 %v482_v19, %v481_v17  ;;  %v490_v22 = vadd.f32 %v489_v20, %v488_v18  ;;  %v464_v23 = vpop.f32.mrf.mxu2  ;;  %v469_v24 = vpop.f32.mrf.mxu3 }
 0x114   : > { %v478_v27 = vmul.f32 %v464_v23, %v393_v8  ;;  %v480_v28 = vmul.f32 %v469_v24, %v393_v8 }
 0x115   : > { %v484_v29 = vrot.slane %v483_v21, 2  ;;  %v491_v30 = vrot.slane %v490_v22, 2 }
 0x116   : > { %v495_v31 = vadd.f32 %v478_v27, %v477_v25  ;;  %v502_v32 = vadd.f32 %v480_v28, %v479_v26 }
 0x117   : > { %v485_v33 = vadd.f32 %v484_v29, %v483_v21  ;;  %v492_v34 = vadd.f32 %v491_v30, %v490_v22 }
 0x118   : > { %v496_v35 = vrot.slane %v495_v31, 4  ;;  %v503_v36 = vrot.slane %v502_v32, 4 }
 0x119   : > { %v486_v39 = vrot.slane %v485_v33, 1  ;;  %v493_v40 = vrot.slane %v492_v34, 1 }
 0x11a   : > { %v497_v37 = vadd.f32 %v496_v35, %v495_v31  ;;  %v504_v38 = vadd.f32 %v503_v36, %v502_v32 }
 0x11b   : > { %v487_v45 = vadd.f32 %v486_v39, %v485_v33  ;;  %v494_v46 = vadd.f32 %v493_v40, %v492_v34 }
 0x11c   : > { %v498_v41 = vrot.slane %v497_v37, 2  ;;  %v505_v42 = vrot.slane %v504_v38, 2 }
 0x11d   : > { %v514_v51 = vsel %vm513_vm9, %v494_v46, %v487_v45 }
 0x11e   : > { %v499_v43 = vadd.f32 %v498_v41, %v497_v37  ;;  %v506_v44 = vadd.f32 %v505_v42, %v504_v38 }
 0x120   : > { %v500_v47 = vrot.slane %v499_v43, 1  ;;  %v507_v48 = vrot.slane %v506_v44, 1 }
 0x122   : > { %v501_v49 = vadd.f32 %v500_v47, %v499_v43  ;;  %v508_v50 = vadd.f32 %v507_v48, %v506_v44 }
 0x124   : > { %v516_v53 = vsel %vm515_vm10, %v501_v49, %v514_v51 }
 0x125   : > { %v518_v54 = vsel %vm517_vm11, %v508_v50, %v516_v53 }
 0x126   : > { %v520_v55 = vadd.f32 %v518_v54, %v472_v52 }
 0x128   : > { %521 = vst [vmem:[#allocation5] sm:$0xf] %v520_v55 }
 0x129 PF: > { %s687_s29 = sshll.u32 %s975_s8, 2  ;;  %s541_s20 = sshll.u32 %s251_s17, 4  ;;  %s542_s20 = int_to_ptr.vmem [resolvable:$true] %s541_s20 }
 0x12a   : > { %s539_s18 = scalar_lea.hbm %s1253_s5, %s687_s29  ;;  %s528_s13 = scalar_lea.sflag [#allocation12], %s249_s2 }
 0x12b   : > { %s543_s11 = sshll.u32 %s539_s18, 4  ;;  %s895_s14 = scalar_lea.hbm %s1253_s5, 8  ;;  %s544_s11 = int_to_ptr.hbm [resolvable:$true] %s543_s11 }
 0x12c   : > { %s889_s25 = sshra.s32 %s544_s11, 4  ;;  %s890_s25 = int_to_ptr.hbm [resolvable:$true] %s889_s25 }
 0x12d   : > { %s891_s26 = scalar_lea.hbm %s890_s25, 4  ;;  %p896_p11 = scmp.lt.s32.totalorder %s890_s25, %s1253_s5 }
 0x12e   : > { %p892_p7 = scmp.ne.s32.totalorder %s890_s25, %s891_s26  ;;  %p897_p1 = scmp.lt.s32.totalorder %s895_s14, %s891_s26 }
 0x12f   : > { %v525_v56 = vld [vmem:[#allocation5] sm:$0xf] }
 0x130   : > { %526 = vst [vmem:[%s251_s17] sm:$0xf] %v525_v56  ;;  %p893_p8 = pnand %p892_p7, %p1100_p3  ;;  %p898_p2 = por %p897_p1, %p896_p11 }
 0x132   : > { %p894_p9 = pneg %p893_p8 }
 0x134   : > { %p899_p13 = pnand %p898_p2, %p894_p9 }
 0x136   : > { %902 = shalt.err (!%p899_p13)
}
 0x137   : > { %713 = dma.vmem_to_hbm [thread:$0]  (%p1100_p3), %s542_s20, 64, %s544_s11, %s528_s13  }
 0x138 PF: > { %s555_s2 = sand.u32 1, %s951_s0   ;;  %p724_p10 = pnand %p649_p5, %p1104_p4 }
 0x139   : > { %s556_s21 = scalar_lea.sflag [#allocation12], %s555_s2 }
 0x13a   : > { %p725_p6 = pneg %p724_p10 }
 0x13c   : > { %946 = dma.done.wait (%p725_p6), %s556_s21, 64  }
 0x13d   : > { %948 = vsyncadd (%p725_p6), %s556_s21, 4294967232  ;;  %s39_s10 = sadd.s32 1, %s983_s10   ;;  %s1270_s19 = sld [smem:[#allocation24_spill]] }
 0x13e   : > { %p36_p12 = scmp.ge.s32.totalorder %s39_s10, 4   ;;  %s1271_s22 = sld [smem:[#allocation21_spill]] }
 0x13f   : > { %s1272_s2 = sld [smem:[#allocation25_spill]]  ;;  %s1275_s0 = smov %s955_s1 }
 0x140   : > { %s1273_s8 = sld [smem:[#allocation22_spill]]  ;;  %s1276_s1 = smov %s959_s30 }
 0x141   : > { %s1274_s9 = sld [smem:[#allocation23_spill]]  ;;  %s1278_s6 = smov %s967_s7 }
 0x142   :  { %38 = sbr.rel (!%p36_p12) target bundleno = 17 (0x11), region = 88 }
 0x143   : > { %s1277_s30 = smov %s1270_s19 }
 0x144   : > { %s1279_s7 = smov %s1271_s22 }
 0x147   :  { %562 = vsyncpa [#allocation11], 1 }
 0x148   :  { %564 = vsyncpa [#allocation11 + $0x1], 1 }
 0x149   :  { %565 = vsyncpa [#allocation12], 1 }
 0x14a   :  { %567 = vsyncpa [#allocation12 + $0x1], 1 }

</bundles_post_ra>
